<compile_context>
chip_gen: v6e
topology: v6e:2x2x1
jax: 0.10.0
libtpu: 0.0.40
codegen_flags: <defaults>
</compile_context>

<pallas_src>
import functools
import numpy as np

import jax
import jax.numpy as jnp
from jax import lax
from jax.experimental import pallas as pl
from jax.experimental.pallas import tpu as pltpu


# ----------------------------- shared math ----------------------------------
def _layernorm_c(x, gamma, beta, eps=1e-6):
    # Normalize over the channel (last) axis == LayerNorm2d over dim=1.
    # eps=1e-6 matches the LayerNorm2d definition in the PyTorch spec.
    u = jnp.mean(x, axis=-1, keepdims=True)
    s = jnp.mean((x - u) ** 2, axis=-1, keepdims=True)
    xn = (x - u) / jnp.sqrt(s + eps)
    return gamma * xn + beta


def _gelu_exact(x):
    # PyTorch nn.GELU() default (erf based, not tanh approximation).
    return 0.5 * x * (1.0 + lax.erf(x / jnp.sqrt(2.0).astype(x.dtype)))


# --------------- Kernel 1: 1x1 conv + LayerNorm2d + GELU --------------------
def shuf_head_kernel(x_ref, w_ref, b_ref, g_ref, bt_ref, o_ref):
    x = x_ref[...].astype(w_ref.dtype)                      # [TN, Cin]
    h = jnp.dot(x, w_ref[...], preferred_element_type=jnp.float32)
    h = h + b_ref[...]                                      # [1, C1] bcast
    h = _layernorm_c(h, g_ref[...], bt_ref[...])
    o_ref[...] = _gelu_exact(h).astype(o_ref.dtype)


# ------- Kernel 2: blur + 3x3 conv (im2col) + (LN) + GELU + 1x1 conv --------
def conv_block_kernel(y_ref, w3_ref, b3_ref, g3_ref, bt3_ref, w4t_ref, b4_ref,
                      o_ref, pad_ref, im_ref, *, Ho, Wo, ni, apply_ln, blur):
    y = y_ref[0]                                            # [Ho, Wo, ni]

    if blur:
        # ReplicationPad2d((1,0,1,0)) built directly in the VMEM scratch
        # (top-left (Ho+1)x(Wo+1) corner), then AvgPool2d(2, stride=1).
        pad_ref[pl.ds(1, Ho), pl.ds(1, Wo), :] = y
        pad_ref[pl.ds(0, 1), pl.ds(1, Wo), :] = y[0:1, :, :]      # top row
        pad_ref[pl.ds(1, Ho), pl.ds(0, 1), :] = y[:, 0:1, :]      # left col
        pad_ref[pl.ds(0, 1), pl.ds(0, 1), :] = y[0:1, 0:1, :]     # corner
        p = pad_ref[pl.ds(0, Ho + 1), pl.ds(0, Wo + 1), :]        # [Ho+1,Wo+1,ni]
        y = 0.25 * (p[:Ho, :Wo, :] + p[:Ho, 1:, :] +
                    p[1:, :Wo, :] + p[1:, 1:, :])

    # SAME zero padding for the 3x3 conv, built in VMEM (no HBM pad pass).
    pad_ref[...] = jnp.zeros_like(pad_ref)
    pad_ref[pl.ds(1, Ho), pl.ds(1, Wo), :] = y
    xp = pad_ref[...]                                       # [Ho+2, Wo+2, ni]

    # im2col: one [Ho*Wo, 9*ni] patch matrix -> a single K = 9*ni MXU matmul
    # (replaces nine K=ni matmuls that underfilled the systolic array).
    for dy in range(3):
        for dx in range(3):
            t = dy * 3 + dx
            im_ref[:, pl.ds(t * ni, ni)] = (
                xp[dy:dy + Ho, dx:dx + Wo, :]
                .reshape(Ho * Wo, ni).astype(im_ref.dtype))

    acc = jnp.dot(im_ref[...], w3_ref[...],
                  preferred_element_type=jnp.float32)       # [Ho*Wo, ni]
    acc = acc + b3_ref[...]
    if apply_ln:
        acc = _layernorm_c(acc, g3_ref[...], bt3_ref[...])
    acc = _gelu_exact(acc)

    # Final 1x1 conv in transposed form: [nf, ni] @ [ni, Ho*Wo] gives a
    # lane-dense [nf, Ho*Wo] output that is directly NCHW for the wrapper.
    out_t = jnp.dot(w4t_ref[...], acc.T.astype(w4t_ref.dtype),
                    preferred_element_type=jnp.float32)
    out_t = out_t + b4_ref[...]                             # [nf, 1] bcast
    o_ref[0] = out_t.astype(o_ref.dtype)


# ------------------------------- glue ---------------------------------------
def pixel_shuffle_nhwc(x, r=2):
    B, H, W, C = x.shape
    c = C // (r * r)
    x = x.reshape(B, H, W, c, r, r)
    x = x.transpose(0, 1, 4, 2, 5, 3)
    return x.reshape(B, H * r, W * r, c)


def _pick_row_tile(n, target=512):
    """Largest row tile <= target that divides n and is a multiple of 8.
    Prefer >= 2 tiles so the 'parallel' grid axis has work to split."""
    best = None
    t = 8
    limit = min(target, n)
    while t <= limit:
        if n % t == 0:
            best = t
        t += 8
    if best is None:
        return n                       # block == full dim (always legal)
    if best == n and (n // 2) % 8 == 0:
        best = n // 2
    return best


# ------------------------------ wrapper --------------------------------------
def up_block_forward(x_nchw, params, *, blur=True, mxu_dtype=jnp.float32):
    """UpBlock forward. mxu_dtype=jnp.bfloat16 casts MXU operands only
    (f32 accumulation); recommended on v6e/v7x, keep f32 on v5e-for-parity."""
    x = jnp.transpose(x_nchw, (0, 2, 3, 1)).astype(jnp.float32)   # NHWC
    B, H, W, Cin = x.shape
    w1 = params["w1"].astype(mxu_dtype)
    b1, g1, bt1 = params["b1"], params["g1"], params["bt1"]
    C1 = w1.shape[1]                     # 4 * ni
    ni = C1 // 4
    Ho, Wo = 2 * H, 2 * W

    # ---- stage 1: 1x1 conv + LayerNorm2d + GELU (row-tiled, parallel) ----
    N = B * H * W
    x2d = x.reshape(N, Cin)
    tn = _pick_row_tile(N)
    y2d = pl.pallas_call(
        shuf_head_kernel,
        out_shape=jax.ShapeDtypeStruct((N, C1), jnp.float32),
        grid=(N // tn,),
        in_specs=[pl.BlockSpec((tn, Cin), lambda i: (i, 0)),
                  pl.BlockSpec((Cin, C1), lambda i: (0, 0)),
                  pl.BlockSpec((1, C1), lambda i: (0, 0)),
                  pl.BlockSpec((1, C1), lambda i: (0, 0)),
                  pl.BlockSpec((1, C1), lambda i: (0, 0))],
        out_specs=pl.BlockSpec((tn, C1), lambda i: (i, 0)),
        compiler_params=pltpu.CompilerParams(
            dimension_semantics=("parallel",)),
    )(x2d, w1, b1, g1, bt1)

    # ---- stage 2: pixel shuffle (single cheap XLA reshape/transpose) ----
    y = pixel_shuffle_nhwc(y2d.reshape(B, H, W, C1), 2)       # [B, Ho, Wo, ni]

    # ---- stages 3+4 fused: blur + pads + 3x3 conv + (LN) + GELU + 1x1 ----
    w3f = params["w3"].reshape(9 * ni, ni).astype(mxu_dtype)  # (dy,dx,ci) x co
    b3, g3, bt3 = params["b3"], params["g3"], params["bt3"]
    w4t = jnp.transpose(params["w4"]).astype(mxu_dtype)       # [nf, ni]
    nf = w4t.shape[0]
    b4c = params["b4"].reshape(nf, 1)
    apply_ln = ni >= 16

    out = pl.pallas_call(
        functools.partial(conv_block_kernel, Ho=Ho, Wo=Wo, ni=ni,
                          apply_ln=apply_ln, blur=blur),
        out_shape=jax.ShapeDtypeStruct((B, nf, Ho * Wo), jnp.float32),
        grid=(B,),
        in_specs=[pl.BlockSpec((1, Ho, Wo, ni), lambda b: (b, 0, 0, 0)),
                  pl.BlockSpec((9 * ni, ni), lambda b: (0, 0)),
                  pl.BlockSpec((1, ni), lambda b: (0, 0)),
                  pl.BlockSpec((1, ni), lambda b: (0, 0)),
                  pl.BlockSpec((1, ni), lambda b: (0, 0)),
                  pl.BlockSpec((nf, ni), lambda b: (0, 0)),
                  pl.BlockSpec((nf, 1), lambda b: (0, 0))],
        out_specs=pl.BlockSpec((1, nf, Ho * Wo), lambda b: (b, 0, 0)),
        scratch_shapes=[pltpu.VMEM((Ho + 2, Wo + 2, ni), jnp.float32),
                        pltpu.VMEM((Ho * Wo, 9 * ni), mxu_dtype)],
        compiler_params=pltpu.CompilerParams(
            dimension_semantics=("parallel",)),
    )(y, w3f, b3, g3, bt3, w4t, b4c)

    # [B, nf, Ho*Wo] is already channels-first; reshape (free) -> NCHW.
    return out.reshape(B, nf, Ho, Wo)


# ------------------------- pure-JAX reference --------------------------------
def ref_forward(x_nchw, params, *, blur=True):
    x = jnp.transpose(x_nchw, (0, 2, 3, 1)).astype(jnp.float32)
    w1 = params["w1"]
    h = jnp.einsum("bhwc,cd->bhwd", x, w1) + params["b1"].reshape(1, 1, 1, -1)
    h = _layernorm_c(h, params["g1"].reshape(1, 1, 1, -1),
                     params["bt1"].reshape(1, 1, 1, -1))
    h = _gelu_exact(h)
    h = pixel_shuffle_nhwc(h, 2)
    if blur:
        p = jnp.pad(h, ((0, 0), (1, 0), (1, 0), (0, 0)), mode="edge")
        h = lax.reduce_window(p, 0.0, lax.add, (1, 2, 2, 1), (1, 1, 1, 1),
                              "VALID") / 4.0
    w3 = params["w3"]
    ni = w3.shape[-1]
    h = lax.conv_general_dilated(
        h, w3, (1, 1), "SAME",
        dimension_numbers=("NHWC", "HWIO", "NHWC")) + params["b3"].reshape(1, 1, 1, -1)
    if ni >= 16:
        h = _layernorm_c(h, params["g3"].reshape(1, 1, 1, -1),
                         params["bt3"].reshape(1, 1, 1, -1))
    h = _gelu_exact(h)
    h = jnp.einsum("bhwc,cd->bhwd", h, params["w4"]) + params["b4"].reshape(1, 1, 1, -1)
    return jnp.transpose(h, (0, 3, 1, 2))


# -------------------------------- main ----------------------------------------
if __name__ == "__main__":
    key = jax.random.PRNGKey(0)
    B, up_in_c, H, W = 2, 64, 8, 8
    ni = up_in_c // 4                 # 16
    nf = max(up_in_c // 4, 16)        # 16

    ks = jax.random.split(key, 8)

    def nrm(k, shape, scale=0.1):
        return (scale * jax.random.normal(k, shape)).astype(jnp.float32)

    params = dict(
        # PixelShuffle_ICNR head: Conv2d(up_in_c, 4*ni, 1) + LayerNorm2d(4*ni)
        w1=nrm(ks[0], (up_in_c, 4 * ni)),
        b1=nrm(ks[1], (1, 4 * ni)),
        g1=jnp.ones((1, 4 * ni), jnp.float32),
        bt1=jnp.zeros((1, 4 * ni), jnp.float32),
        # conv block: Conv2d(ni, ni, 3, pad=1) + LayerNorm2d(ni) + Conv2d(ni, nf, 1)
        w3=nrm(ks[2], (3, 3, ni, ni)),
        b3=nrm(ks[3], (1, ni)),
        g3=jnp.ones((1, ni), jnp.float32),
        bt3=jnp.zeros((1, ni), jnp.float32),
        w4=nrm(ks[4], (ni, nf)),
        b4=nrm(ks[5], (1, nf)),
    )

    x = jax.random.normal(ks[6], (B, up_in_c, H, W), jnp.float32)

    out = jax.block_until_ready(up_block_forward(x, params, blur=True))
    assert out.shape == (B, nf, 2 * H, 2 * W), out.shape

    ref = jax.block_until_ready(ref_forward(x, params, blur=True))
    np.testing.assert_allclose(np.asarray(out), np.asarray(ref),
                               rtol=2e-4, atol=2e-4)
    print("KERNEL_OK")
</pallas_src>

<mosaic_0001>
module attributes {stable_mosaic.version = 11 : i64} {
  func.func @shuf_head_kernel(%arg0: i32, %arg1: memref<64x64xf32, #tpu.memory_space<vmem>>, %arg2: memref<64x64xf32, #tpu.memory_space<vmem>>, %arg3: memref<1x64xf32, #tpu.memory_space<vmem>>, %arg4: memref<1x64xf32, #tpu.memory_space<vmem>>, %arg5: memref<1x64xf32, #tpu.memory_space<vmem>>, %arg6: memref<64x64xf32, #tpu.memory_space<vmem>>) attributes {dimension_semantics = [#tpu.dimension_semantics<parallel>], iteration_bounds = array<i64: 2>, scalar_prefetch = 0 : i64, scratch_operands = 0 : i64, tpu.core_type = #tpu.core_type<tc>, window_params = [{transform_indices = @transform_0, window_bounds = array<i64: 64, 64>}, {pipeline_mode = #tpu.pipeline_mode<synchronous>, transform_indices = @transform_1, window_bounds = array<i64: 64, 64>}, {pipeline_mode = #tpu.pipeline_mode<synchronous>, transform_indices = @transform_2, window_bounds = array<i64: 1, 64>}, {pipeline_mode = #tpu.pipeline_mode<synchronous>, transform_indices = @transform_3, window_bounds = array<i64: 1, 64>}, {pipeline_mode = #tpu.pipeline_mode<synchronous>, transform_indices = @transform_4, window_bounds = array<i64: 1, 64>}, {transform_indices = @transform_5, window_bounds = array<i64: 64, 64>}]} {
    %c0 = arith.constant 0 : index
    %c0_0 = arith.constant 0 : index
    %0 = vector.load %arg1[%c0, %c0_0] : memref<64x64xf32, #tpu.memory_space<vmem>>, vector<64x64xf32>
    %c0_1 = arith.constant 0 : index
    %c0_2 = arith.constant 0 : index
    %1 = vector.load %arg2[%c0_1, %c0_2] : memref<64x64xf32, #tpu.memory_space<vmem>>, vector<64x64xf32>
    %cst = arith.constant dense<0.000000e+00> : vector<64x64xf32>
    %2 = tpu.matmul %0, %1, %cst {dimension_numbers = #tpu.dot_dimension_numbers<[1], [0], [0], [1], [0, 0, 1, 1], [], []>} : vector<64x64xf32>, vector<64x64xf32>, vector<64x64xf32> -> vector<64x64xf32>
    %c0_3 = arith.constant 0 : index
    %c0_4 = arith.constant 0 : index
    %3 = vector.load %arg3[%c0_3, %c0_4] : memref<1x64xf32, #tpu.memory_space<vmem>>, vector<1x64xf32>
    %4 = vector.broadcast %3 : vector<1x64xf32> to vector<64x64xf32>
    %5 = arith.addf %2, %4 : vector<64x64xf32>
    %c0_5 = arith.constant 0 : index
    %c0_6 = arith.constant 0 : index
    %6 = vector.load %arg4[%c0_5, %c0_6] : memref<1x64xf32, #tpu.memory_space<vmem>>, vector<1x64xf32>
    %c0_7 = arith.constant 0 : index
    %c0_8 = arith.constant 0 : index
    %7 = vector.load %arg5[%c0_7, %c0_8] : memref<1x64xf32, #tpu.memory_space<vmem>>, vector<1x64xf32>
    %cst_9 = arith.constant dense<0.000000e+00> : vector<64xf32>
    %8 = vector.multi_reduction <add>, %5, %cst_9 [1] : vector<64x64xf32> to vector<64xf32>
    %9 = vector.shape_cast %8 : vector<64xf32> to vector<64x1xf32>
    %cst_10 = arith.constant 6.400000e+01 : f32
    %10 = vector.broadcast %cst_10 : f32 to vector<64x1xf32>
    %11 = arith.divf %9, %10 : vector<64x1xf32>
    %12 = vector.broadcast %11 : vector<64x1xf32> to vector<64x64xf32>
    %13 = arith.subf %5, %12 : vector<64x64xf32>
    %14 = arith.mulf %13, %13 : vector<64x64xf32>
    %cst_11 = arith.constant dense<0.000000e+00> : vector<64xf32>
    %15 = vector.multi_reduction <add>, %14, %cst_11 [1] : vector<64x64xf32> to vector<64xf32>
    %16 = vector.shape_cast %15 : vector<64xf32> to vector<64x1xf32>
    %cst_12 = arith.constant 6.400000e+01 : f32
    %17 = vector.broadcast %cst_12 : f32 to vector<64x1xf32>
    %18 = arith.divf %16, %17 : vector<64x1xf32>
    %19 = vector.broadcast %11 : vector<64x1xf32> to vector<64x64xf32>
    %20 = arith.subf %5, %19 : vector<64x64xf32>
    %cst_13 = arith.constant 9.99999997E-7 : f32
    %21 = vector.broadcast %cst_13 : f32 to vector<64x1xf32>
    %22 = arith.addf %18, %21 : vector<64x1xf32>
    %23 = math.sqrt %22 : vector<64x1xf32>
    %24 = vector.broadcast %23 : vector<64x1xf32> to vector<64x64xf32>
    %25 = arith.divf %20, %24 : vector<64x64xf32>
    %26 = vector.broadcast %6 : vector<1x64xf32> to vector<64x64xf32>
    %27 = arith.mulf %26, %25 : vector<64x64xf32>
    %28 = vector.broadcast %7 : vector<1x64xf32> to vector<64x64xf32>
    %29 = arith.addf %27, %28 : vector<64x64xf32>
    %cst_14 = arith.constant 5.000000e-01 : f32
    %30 = vector.broadcast %cst_14 : f32 to vector<64x64xf32>
    %31 = arith.mulf %30, %29 : vector<64x64xf32>
    %cst_15 = arith.constant 2.000000e+00 : f32
    %32 = math.sqrt %cst_15 : f32
    %33 = vector.broadcast %32 : f32 to vector<64x64xf32>
    %34 = arith.divf %29, %33 : vector<64x64xf32>
    %35 = math.erf %34 : vector<64x64xf32>
    %cst_16 = arith.constant 1.000000e+00 : f32
    %36 = vector.broadcast %cst_16 : f32 to vector<64x64xf32>
    %37 = arith.addf %36, %35 : vector<64x64xf32>
    %38 = arith.mulf %31, %37 : vector<64x64xf32>
    %c0_17 = arith.constant 0 : index
    %c0_18 = arith.constant 0 : index
    %39 = vector.load %arg6[%c0_17, %c0_18] : memref<64x64xf32, #tpu.memory_space<vmem>>, vector<64x64xf32>
    tpu.vector_store %arg6[%c0_17, %c0_18], %38 {strides = array<i32>} : memref<64x64xf32, #tpu.memory_space<vmem>>, vector<64x64xf32>,
    return
  }
  func.func @transform_0(%arg0: i32) -> (i32, i32) {
    %c0_i32 = arith.constant 0 : i32
    %c0_i32_0 = arith.constant 0 : i32
    return %arg0, %c0_i32 : i32, i32
  }
  func.func @transform_1(%arg0: i32) -> (i32, i32) {
    %c0_i32 = arith.constant 0 : i32
    %c0_i32_0 = arith.constant 0 : i32
    %c0_i32_1 = arith.constant 0 : i32
    return %c0_i32, %c0_i32_0 : i32, i32
  }
  func.func @transform_2(%arg0: i32) -> (i32, i32) {
    %c0_i32 = arith.constant 0 : i32
    %c0_i32_0 = arith.constant 0 : i32
    %c0_i32_1 = arith.constant 0 : i32
    return %c0_i32, %c0_i32_0 : i32, i32
  }
  func.func @transform_3(%arg0: i32) -> (i32, i32) {
    %c0_i32 = arith.constant 0 : i32
    %c0_i32_0 = arith.constant 0 : i32
    %c0_i32_1 = arith.constant 0 : i32
    return %c0_i32, %c0_i32_0 : i32, i32
  }
  func.func @transform_4(%arg0: i32) -> (i32, i32) {
    %c0_i32 = arith.constant 0 : i32
    %c0_i32_0 = arith.constant 0 : i32
    %c0_i32_1 = arith.constant 0 : i32
    return %c0_i32, %c0_i32_0 : i32, i32
  }
  func.func @transform_5(%arg0: i32) -> (i32, i32) {
    %c0_i32 = arith.constant 0 : i32
    %c0_i32_0 = arith.constant 0 : i32
    return %arg0, %c0_i32 : i32, i32
  }
}

</mosaic_0001>

<bundles_post_ra>
// kernel: tpu_custom_call.1
= control target key start
LH: loop header
LB: loop body
LE: loop exit
PB: predicated region body
PF: predicated region fallthrough
CT: control target
= control target key end

     0   :  { %s853_s18 = smov 0   ;;  %s1008_s0 = inlined_call_operand.vmem [shape: f32[128,64], index: 0, kind: input, shape index: {}]   ;;  %s1009_s1 = inlined_call_operand.vmem [shape: f32[64,64], index: 1, kind: input, shape index: {}]   ;;  %s1010_s2 = inlined_call_operand.vmem [shape: f32[1,64], index: 2, kind: input, shape index: {}]   ;;  %s1011_s3 = inlined_call_operand.vmem [shape: f32[1,64], index: 3, kind: input, shape index: {}]   ;;  %s1012_s4 = inlined_call_operand.vmem [shape: f32[1,64], index: 4, kind: input, shape index: {}]   ;;  %s1013_s5 = inlined_call_operand.vmem [shape: f32[128,64], index: 5, kind: output, shape index: {}]  }
   0x1 LB: > { %s677_s19 = sadd.s32 4294967295, %s821_s18   ;;  %p681_p0 = scmp.ge.s32.totalorder %s821_s18, 1  ;;  %s821_s18 = sphi %s853_s18, %s15_s18  }
   0x2   : > { %p188_p1 = scmp.lt.s32.totalorder %s821_s18, 3 }
   0x4   : > { %p189_p2 = pnand %p681_p0, %p188_p1 }
   0x5   : > { %s682_s24 = sshll.u32 (!%p189_p2), %s677_s19, 3 }
   0x6   : > { %192 = sbr.rel (%p189_p2) target bundleno = 587 (0x24b), region = 40  ;;  %p217_p3 = scmp.lt.s32.totalorder (!%p189_p2), %s682_s24, 15 }
   0xb   : > { %v243_v0 = vld [vmem:[%s1009_s1 + $0x38] sm:$0xff]  ;;  %v242_v1 = vld [vmem:[%s1009_s1 + $0x30] sm:$0xff]  ;;  %v241_v2 = vld [vmem:[%s1009_s1 + $0x28] sm:$0xff]  ;;  %s1015_s24 = smov (!%p217_p3, %s682_s24), 15  ;;  %vm251_vm0 = vcmask 523264  }
   0xc   : > { %715 = vmatprep.subr.mxu0 %v243_v0  ;;  %743 = vmatprep.subr.mxu1 %v243_v0  ;;  %v240_v3 = vld [vmem:[%s1009_s1 + $0x20] sm:$0xff]  ;;  %v239_v4 = vld [vmem:[%s1009_s1 + $0x18] sm:$0xff]  ;;  %v238_v5 = vld [vmem:[%s1009_s1 + $0x10] sm:$0xff]  ;;  %s683_s8 = sshll.u32 %s1015_s24, 3 }
   0xd   : > { %716 = vmatpush3.msra.mxu0 %v243_v0  ;;  %751 = vmatpush3.msra.mxu1 %v243_v0  ;;  %v237_v6 = vld [vmem:[%s1009_s1 + $0x8] sm:$0xff]  ;;  %s220_s13 = scalar_lea.vmem %s1008_s0, %s683_s8  ;;  %v236_v7 = vld [vmem:[%s1009_s1] sm:$0xff]  ;;  %s987_s26 = scalar_lea.vmem %s1013_s5, %s683_s8 }
   0xe   : > { %717 = vmatprep.subr.mxu0 %v242_v1  ;;  %744 = vmatprep.subr.mxu1 %v242_v1  ;;  %v228_v8 = vld [vmem:[%s220_s13] sm:$0xff]  ;;  %v229_v10 = vld [vmem:[%s220_s13 + $0x8] sm:$0xff]  ;;  %v230_v12 = vld [vmem:[%s220_s13 + $0x10] sm:$0xff] }
   0xf   : > { %718 = vmatpush3.msra.mxu0 %v242_v1  ;;  %752 = vmatpush3.msra.mxu1 %v242_v1  ;;  %v232_v9 = vld [vmem:[%s220_s13 + $0x20] sm:$0xff]  ;;  %v233_v11 = vld [vmem:[%s220_s13 + $0x28] sm:$0xff]  ;;  %v234_v13 = vld [vmem:[%s220_s13 + $0x30] sm:$0xff] }
  0x10   : > { %719 = vmatprep.subr.mxu0 %v241_v2  ;;  %745 = vmatprep.subr.mxu1 %v241_v2  ;;  %v231_v14 = vld [vmem:[%s220_s13 + $0x18] sm:$0xff]  ;;  %v686_v16 = vld [vmem:[%s1010_s2] ss:$0 sm:$0xff] }
  0x11   : > { %720 = vmatpush3.msra.mxu0 %v241_v2  ;;  %753 = vmatpush3.msra.mxu1 %v241_v2  ;;  %v235_v15 = vld [vmem:[%s220_s13 + $0x38] sm:$0xff] }
  0x12   : > { %721 = vmatprep.subr.mxu0 %v240_v3  ;;  %746 = vmatprep.subr.mxu1 %v240_v3 }
  0x13   : > { %722 = vmatpush3.msra.mxu0 %v240_v3  ;;  %754 = vmatpush3.msra.mxu1 %v240_v3 }
  0x14   : > { %723 = vmatprep.subr.mxu0 %v239_v4  ;;  %747 = vmatprep.subr.mxu1 %v239_v4 }
  0x15   : > { %724 = vmatpush3.msra.mxu0 %v239_v4  ;;  %755 = vmatpush3.msra.mxu1 %v239_v4 }
  0x16   : > { %725 = vmatprep.subr.mxu0 %v238_v5  ;;  %748 = vmatprep.subr.mxu1 %v238_v5 }
  0x17   : > { %726 = vmatpush3.msra.mxu0 %v238_v5  ;;  %756 = vmatpush3.msra.mxu1 %v238_v5 }
  0x18   : > { %727 = vmatprep.subr.mxu0 %v237_v6  ;;  %749 = vmatprep.subr.mxu1 %v237_v6 }
  0x19   : > { %728 = vmatpush3.msra.mxu0 %v237_v6  ;;  %757 = vmatpush3.msra.mxu1 %v237_v6 }
  0x1a   : > { %729 = vmatprep.subr.mxu0 %v236_v7  ;;  %750 = vmatprep.subr.mxu1 %v236_v7 }
  0x1b   : > { %730 = vmatpush3.msra.mxu0 %v236_v7  ;;  %758 = vmatpush3.msra.mxu1 %v236_v7 }
  0x1c   : > { %731 = vmatprep.mubr.msk.f32.mxu0 %vm251_vm0, %v228_v8  ;;  %737 = vmatprep.mubr.msk.f32.mxu1 %vm251_vm0, %v232_v9 }
  0x1d   : > { %732 = vmatmul.mubr.msk.f32.vlgmr.msra.gmra.mxu0 %vm251_vm0, %v229_v10  ;;  %738 = vmatmul.mubr.msk.f32.vlgmr.msra.gmra.mxu1 %vm251_vm0, %v233_v11 }
  0x1e   : > { %734 = vmatprep.mubr.msk.f32.mxu0 %vm251_vm0, %v230_v12  ;;  %740 = vmatprep.mubr.msk.f32.mxu1 %vm251_vm0, %v234_v13 }
  0x21   : > { %735 = vmatmul.mubr.msk.f32.gmra.mxu0 %vm251_vm0, %v231_v14  ;;  %741 = vmatmul.mubr.msk.f32.gmra.mxu1 %vm251_vm0, %v235_v15 }
  0xdd   : > { %v733_v17 = vpop.f32.mrf.mxu0  ;;  %v739_v18 = vpop.f32.mrf.mxu1 }
  0xde   : > { %v348_v19 = vadd.f32 %v733_v17, %v686_v16  ;;  %v368_v20 = vadd.f32 %v739_v18, %v686_v16 }
  0xdf   : > { %v342_v21 = vpop.f32.mrf.mxu0  ;;  %v362_v22 = vpop.f32.mrf.mxu1 }
  0xe0   : > { %v343_v23 = vadd.f32 %v686_v16, %v342_v21  ;;  %v398_v24 = vsel %vm251_vm0, %v368_v20, 0.0  ;;  %v386_v25 = vsel %vm251_vm0, %v348_v19, 0.0  ;;  %v363_v31 = vadd.f32 %v686_v16, %v362_v22 }
  0xe1   : > { %399 = vadd.xlane.f32.xlu1 %v398_v24  ;;  %387 = vadd.xlane.f32.xlu0 %v386_v25  ;;  %v736_v26 = vpop.f32.mrf.mxu0  ;;  %v742_v27 = vpop.f32.mrf.mxu1 }
  0xe2   : > { %v358_v28 = vadd.f32 %v736_v26, %v686_v16  ;;  %v383_v34 = vsel %vm251_vm0, %v343_v23, 0.0  ;;  %v378_v35 = vadd.f32 %v742_v27, %v686_v16  ;;  %v395_v38 = vsel %vm251_vm0, %v363_v31, 0.0 }
  0xe3   : > { %v352_v29 = vpop.f32.mrf.mxu0  ;;  %v372_v30 = vpop.f32.mrf.mxu1 }
  0xe4   : > { %v392_v32 = vsel %vm251_vm0, %v358_v28, 0.0  ;;  %v353_v33 = vadd.f32 %v686_v16, %v352_v29  ;;  %v373_v36 = vadd.f32 %v686_v16, %v372_v30  ;;  %v404_v39 = vsel %vm251_vm0, %v378_v35, 0.0 }
  0xe5   : > { %393 = vadd.xlane.f32.xlu1 %v392_v32  ;;  %384 = vadd.xlane.f32.xlu0 %v383_v34 }
  0xe6   : > { %v389_v37 = vsel %vm251_vm0, %v353_v33, 0.0  ;;  %v401_v40 = vsel %vm251_vm0, %v373_v36, 0.0 }
  0xe9   : > { %390 = vadd.xlane.f32.xlu1 %v389_v37  ;;  %396 = vadd.xlane.f32.xlu0 %v395_v38 }
  0xed   : > { %405 = vadd.xlane.f32.xlu1 %v404_v39  ;;  %402 = vadd.xlane.f32.xlu0 %v401_v40 }
 0x16a   : > { %v400_v41 = vpop.xlane.xlu1 %399  ;;  %v388_v42 = vpop.xlane.xlu0 %387 }
 0x16b   : > { %v413_v43 = vmul.f32 0.015625, %v400_v41  ;;  %v409_v44 = vmul.f32 0.015625, %v388_v42 }
 0x16d   : > { %v912_v45 = vsub.f32 %v368_v20, %v413_v43  ;;  %v914_v46 = vsub.f32 %v348_v19, %v409_v44 }
 0x16e   : > { %v394_v47 = vpop.xlane.xlu1 %393  ;;  %v385_v48 = vpop.xlane.xlu0 %384 }
 0x16f   : > { %v411_v49 = vmul.f32 0.015625, %v394_v47  ;;  %v408_v50 = vmul.f32 0.015625, %v385_v48  ;;  %v425_v51 = vmul.f32 %v914_v46, %v914_v46  ;;  %v429_v55 = vmul.f32 %v912_v45, %v912_v45 }
 0x171   : > { %v918_v52 = vsub.f32 %v358_v28, %v411_v49  ;;  %v920_v53 = vsub.f32 %v343_v23, %v408_v50  ;;  %v435_v54 = vsel %vm251_vm0, %v425_v51, 0.0  ;;  %v447_v0 = vsel %vm251_vm0, %v429_v55, 0.0 }
 0x172   : > { %436 = vadd.xlane.f32.xlu1 %v435_v54  ;;  %v391_v56 = vpop.xlane.xlu1 %390  ;;  %v397_v57 = vpop.xlane.xlu0 %396 }
 0x173   : > { %v410_v58 = vmul.f32 0.015625, %v391_v56  ;;  %v412_v59 = vmul.f32 0.015625, %v397_v57  ;;  %v424_v60 = vmul.f32 %v920_v53, %v920_v53  ;;  %v427_v61 = vmul.f32 %v918_v52, %v918_v52 }
 0x175   : > { %v929_v62 = vsub.f32 %v353_v33, %v410_v58  ;;  %v931_v63 = vsub.f32 %v363_v31, %v412_v59  ;;  %v432_v1 = vsel %vm251_vm0, %v424_v60, 0.0  ;;  %v441_v7 = vsel %vm251_vm0, %v427_v61, 0.0 }
 0x176   : > { %448 = vadd.xlane.f32.xlu1 %v447_v0  ;;  %v406_v2 = vpop.xlane.xlu1 %405  ;;  %433 = vadd.xlane.f32.xlu0 %v432_v1  ;;  %v403_v3 = vpop.xlane.xlu0 %402 }
 0x177   : > { %v415_v4 = vmul.f32 0.015625, %v406_v2  ;;  %v414_v5 = vmul.f32 0.015625, %v403_v3  ;;  %v428_v6 = vmul.f32 %v931_v63, %v931_v63  ;;  %v426_v11 = vmul.f32 %v929_v62, %v929_v62 }
 0x179   : > { %v938_v8 = vsub.f32 %v378_v35, %v415_v4  ;;  %v940_v9 = vsub.f32 %v373_v36, %v414_v5  ;;  %v444_v10 = vsel %vm251_vm0, %v428_v6, 0.0  ;;  %v438_v14 = vsel %vm251_vm0, %v426_v11, 0.0 }
 0x17a   : > { %442 = vadd.xlane.f32.xlu1 %v441_v7  ;;  %445 = vadd.xlane.f32.xlu0 %v444_v10 }
 0x17b   : > { %v431_v12 = vmul.f32 %v938_v8, %v938_v8  ;;  %v430_v15 = vmul.f32 %v940_v9, %v940_v9 }
 0x17d   : > { %v453_v13 = vsel %vm251_vm0, %v431_v12, 0.0  ;;  %v450_v16 = vsel %vm251_vm0, %v430_v15, 0.0 }
 0x17e   : > { %454 = vadd.xlane.f32.xlu1 %v453_v13  ;;  %439 = vadd.xlane.f32.xlu0 %v438_v14 }
 0x182   : > { %451 = vadd.xlane.f32.xlu0 %v450_v16 }
 0x1fb   : > { %v437_v17 = vpop.xlane.xlu1 %436 }
 0x1fc   : > { %v457_v18 = vmul.f32 0.015625, %v437_v17 }
 0x1fe   : > { %v465_v19 = vadd.f32 1e-06, %v457_v18 }
 0x1ff   : > { %v449_v20 = vpop.xlane.xlu1 %448  ;;  %v434_v21 = vpop.xlane.xlu0 %433 }
 0x200   : > { %767 = vrsqrt.f32 %v465_v19  ;;  %v461_v22 = vmul.f32 0.015625, %v449_v20  ;;  %v456_v23 = vmul.f32 0.015625, %v434_v21  ;;  %vm481_vm1 = vcmp.eq.f32.partialorder %v465_v19, inf  ;;  %v695_v21 = vld [vmem:[%s1011_s3] ss:$0 sm:$0xff] }
 0x201   : > { %v484_v42 = vand.u32 2147483648, %v465_v19  ;;  %vm483_vm2 = vcmp.eq.f32.partialorder %v465_v19, 0.0 }
 0x202   : > { %v469_v24 = vadd.f32 1e-06, %v461_v22  ;;  %v464_v25 = vadd.f32 1e-06, %v456_v23 }
 0x203   : > { %v443_v26 = vpop.xlane.xlu1 %442  ;;  %v446_v27 = vpop.xlane.xlu0 %445 }
 0x204   : > { %v459_v28 = vmul.f32 0.015625, %v443_v26  ;;  %v460_v29 = vmul.f32 0.015625, %v446_v27  ;;  %769 = vrsqrt.f32 %v469_v24  ;;  %vm509_vm3 = vcmp.eq.f32.partialorder %v469_v24, inf  ;;  %v696_v26 = vld [vmem:[%s1012_s4] ss:$0 sm:$0xff] }
 0x205   : > { %771 = vrsqrt.f32 %v464_v25  ;;  %v512_v51 = vand.u32 2147483648, %v469_v24  ;;  %vm511_vm4 = vcmp.eq.f32.partialorder %v469_v24, 0.0  ;;  %vm474_vm5 = vcmp.eq.f32.partialorder %v464_v25, inf }
 0x206   : > { %v467_v30 = vadd.f32 1e-06, %v459_v28  ;;  %v468_v31 = vadd.f32 1e-06, %v460_v29  ;;  %v477_v56 = vand.u32 2147483648, %v464_v25  ;;  %vm476_vm6 = vcmp.eq.f32.partialorder %v464_v25, 0.0 }
 0x207   : > { %v455_v32 = vpop.xlane.xlu1 %454  ;;  %v440_v33 = vpop.xlane.xlu0 %439 }
 0x208   : > { %v463_v34 = vmul.f32 0.015625, %v455_v32  ;;  %v458_v35 = vmul.f32 0.015625, %v440_v33  ;;  %773 = vrsqrt.f32 %v467_v30  ;;  %vm495_vm7 = vcmp.eq.f32.partialorder %v467_v30, inf }
 0x209   : > { %775 = vrsqrt.f32 %v468_v31  ;;  %v498_v1 = vand.u32 2147483648, %v467_v30  ;;  %vm497_vm8 = vcmp.eq.f32.partialorder %v467_v30, 0.0  ;;  %vm502_vm9 = vcmp.eq.f32.partialorder %v468_v31, inf }
 0x20a   : > { %v471_v36 = vadd.f32 1e-06, %v463_v34  ;;  %v952_v37 = vadd.f32 1e-06, %v458_v35  ;;  %v505_v4 = vand.u32 2147483648, %v468_v31  ;;  %vm504_vm10 = vcmp.eq.f32.partialorder %v468_v31, 0.0 }
 0x20b   : > { %v452_v38 = vpop.xlane.xlu0 %451 }
 0x20c   : > { %v462_v39 = vmul.f32 0.015625, %v452_v38  ;;  %777 = vrsqrt.f32 %v471_v36  ;;  %vm523_vm11 = vcmp.eq.f32.partialorder %v471_v36, inf  ;;  %v526_v13 = vand.u32 2147483648, %v471_v36 }
 0x20d   : > { %v768_v40 = vpop.eup %767  ;;  %779 = vrsqrt.f32 %v952_v37  ;;  %vm525_vm12 = vcmp.eq.f32.partialorder %v471_v36, 0.0  ;;  %vm488_vm13 = vcmp.eq.f32.partialorder %v952_v37, inf  ;;  %v491_v16 = vand.u32 2147483648, %v952_v37 }
 0x20e   : > { %v480_v41 = vmul.f32 %v768_v40, %v465_v19  ;;  %v955_v43 = vadd.f32 1e-06, %v462_v39  ;;  %vm490_vm14 = vcmp.eq.f32.partialorder %v952_v37, 0.0 }
 0x210   : > { %v482_v44 = vsel %vm481_vm1, %v465_v19, %v480_v41  ;;  %781 = vrsqrt.f32 %v955_v43  ;;  %vm516_vm15 = vcmp.eq.f32.partialorder %v955_v43, inf  ;;  %vm518_vm1 = vcmp.eq.f32.partialorder %v955_v43, 0.0 }
 0x211   : > { %v485_v47 = vsel %vm483_vm2, %v484_v42, %v482_v44  ;;  %v770_v48 = vpop.eup %769 }
 0x212   : > { %783 = vrcp.f32 %v485_v47  ;;  %v772_v49 = vpop.eup %771  ;;  %v508_v50 = vmul.f32 %v770_v48, %v469_v24 }
 0x213   : > { %v473_v54 = vmul.f32 %v772_v49, %v464_v25 }
 0x214   : > { %v510_v55 = vsel %vm509_vm3, %v469_v24, %v508_v50 }
 0x215   : > { %v774_v57 = vpop.eup %773  ;;  %v513_v58 = vsel %vm511_vm4, %v512_v51, %v510_v55  ;;  %v475_v59 = vsel %vm474_vm5, %v464_v25, %v473_v54  ;;  %v519_v25 = vand.u32 2147483648, %v955_v43 }
 0x216   : > { %v776_v60 = vpop.eup %775  ;;  %785 = vrcp.f32 %v513_v58  ;;  %v478_v61 = vsel %vm476_vm6, %v477_v56, %v475_v59  ;;  %v494_v0 = vmul.f32 %v774_v57, %v467_v30 }
 0x217   : > { %787 = vrcp.f32 %v478_v61  ;;  %v501_v2 = vmul.f32 %v776_v60, %v468_v31 }
 0x218   : > { %v496_v3 = vsel %vm495_vm7, %v467_v30, %v494_v0 }
 0x219   : > { %v778_v5 = vpop.eup %777  ;;  %v499_v6 = vsel %vm497_vm8, %v498_v1, %v496_v3  ;;  %v503_v7 = vsel %vm502_vm9, %v468_v31, %v501_v2 }
 0x21a   : > { %v780_v10 = vpop.eup %779  ;;  %789 = vrcp.f32 %v499_v6  ;;  %v506_v11 = vsel %vm504_vm10, %v505_v4, %v503_v7  ;;  %v522_v12 = vmul.f32 %v778_v5, %v471_v36 }
 0x21b   : > { %791 = vrcp.f32 %v506_v11  ;;  %v487_v14 = vmul.f32 %v780_v10, %v952_v37 }
 0x21c   : > { %v524_v15 = vsel %vm523_vm11, %v471_v36, %v522_v12 }
 0x21d   : > { %v782_v17 = vpop.eup %781  ;;  %v527_v18 = vsel %vm525_vm12, %v526_v13, %v524_v15  ;;  %v489_v19 = vsel %vm488_vm13, %v952_v37, %v487_v14 }
 0x21e   : > { %793 = vrcp.f32 %v527_v18  ;;  %v492_v22 = vsel %vm490_vm14, %v491_v16, %v489_v19  ;;  %v515_v23 = vmul.f32 %v782_v17, %v955_v43 }
 0x21f   : > { %v784_v20 = vpop.eup %783  ;;  %795 = vrcp.f32 %v492_v22 }
 0x220   : > { %v531_v24 = vmul.f32 %v784_v20, %v914_v46  ;;  %v517_v27 = vsel %vm516_vm15, %v955_v43, %v515_v23 }
 0x221   : > { %v520_v29 = vsel %vm518_vm1, %v519_v25, %v517_v27 }
 0x222   : > { %v551_v28 = vmul.f32 %v695_v21, %v531_v24  ;;  %797 = vrcp.f32 %v520_v29 }
 0x223   : > { %v786_v30 = vpop.eup %785 }
 0x224   : > { %v565_v31 = vadd.f32 %v696_v26, %v551_v28  ;;  %v788_v32 = vpop.eup %787  ;;  %v539_v46 = vmul.f32 %v786_v30, %v912_v45 }
 0x225   : > { %v529_v34 = vmul.f32 %v788_v32, %v920_v53 }
 0x226   : > { %v582_v33 = vmul.f32 0.70710677, %v565_v31  ;;  %v555_v35 = vmul.f32 %v695_v21, %v539_v46  ;;  %v573_v3 = vmul.f32 0.5, %v565_v31 }
 0x227   : > { %v790_v36 = vpop.eup %789  ;;  %v550_v37 = vmul.f32 %v695_v21, %v529_v34 }
 0x228   : > { %799 = verf.f32 %v582_v33  ;;  %v792_v38 = vpop.eup %791  ;;  %v569_v39 = vadd.f32 %v696_v26, %v555_v35  ;;  %v535_v40 = vmul.f32 %v790_v36, %v918_v52 }
 0x229   : > { %v564_v41 = vadd.f32 %v696_v26, %v550_v37  ;;  %v537_v42 = vmul.f32 %v792_v38, %v931_v63 }
 0x22a   : > { %v586_v43 = vmul.f32 0.70710677, %v569_v39  ;;  %v553_v44 = vmul.f32 %v695_v21, %v535_v40  ;;  %v577_v7 = vmul.f32 0.5, %v569_v39 }
 0x22b   : > { %v794_v47 = vpop.eup %793  ;;  %v581_v48 = vmul.f32 0.70710677, %v564_v41  ;;  %v554_v49 = vmul.f32 %v695_v21, %v537_v42  ;;  %v572_v11 = vmul.f32 0.5, %v564_v41 }
 0x22c   : > { %v796_v45 = vpop.eup %795  ;;  %801 = verf.f32 %v586_v43  ;;  %v567_v50 = vadd.f32 %v696_v26, %v553_v44  ;;  %v543_v53 = vmul.f32 %v794_v47, %v938_v8 }
 0x22d   : > { %803 = verf.f32 %v581_v48  ;;  %v568_v51 = vadd.f32 %v696_v26, %v554_v49  ;;  %v533_v54 = vmul.f32 %v796_v45, %v929_v62 }
 0x22e   : > { %v584_v55 = vmul.f32 0.70710677, %v567_v50  ;;  %v557_v56 = vmul.f32 %v695_v21, %v543_v53  ;;  %v575_v17 = vmul.f32 0.5, %v567_v50 }
 0x22f   : > { %v798_v52 = vpop.eup %797  ;;  %v585_v57 = vmul.f32 0.70710677, %v568_v51  ;;  %v552_v63 = vmul.f32 %v695_v21, %v533_v54  ;;  %v576_v19 = vmul.f32 0.5, %v568_v51 }
 0x230   : > { %805 = verf.f32 %v584_v55  ;;  %v571_v58 = vadd.f32 %v696_v26, %v557_v56  ;;  %v541_v59 = vmul.f32 %v798_v52, %v940_v9 }
 0x231   : > { %807 = verf.f32 %v585_v57  ;;  %v566_v60 = vadd.f32 %v696_v26, %v552_v63 }
 0x232   : > { %v588_v61 = vmul.f32 0.70710677, %v571_v58  ;;  %v556_v0 = vmul.f32 %v695_v21, %v541_v59  ;;  %v579_v25 = vmul.f32 0.5, %v571_v58 }
 0x233   : > { %v583_v1 = vmul.f32 0.70710677, %v566_v60  ;;  %v574_v27 = vmul.f32 0.5, %v566_v60 }
 0x234   : > { %809 = verf.f32 %v588_v61  ;;  %v570_v2 = vadd.f32 %v696_v26, %v556_v0 }
 0x235   : > { %v800_v8 = vpop.eup %799  ;;  %811 = verf.f32 %v583_v1 }
 0x236   : > { %v598_v62 = vadd.f32 1.0, %v800_v8  ;;  %v587_v9 = vmul.f32 0.70710677, %v570_v2  ;;  %v578_v32 = vmul.f32 0.5, %v570_v2 }
 0x238   : > { %v606_v4 = vmul.f32 %v598_v62, %v573_v3  ;;  %813 = verf.f32 %v587_v9 }
 0x239   : > { %v802_v5 = vpop.eup %801 }
 0x23a   : > { %614 = vst.msk [vmem:[%s987_s26 + $0x8] sm:$0xff] %vm251_vm0, %v606_v4  ;;  %v804_v6 = vpop.eup %803  ;;  %v602_v10 = vadd.f32 1.0, %v802_v5 }
 0x23b   : > { %v597_v12 = vadd.f32 1.0, %v804_v6 }
 0x23c   : > { %v610_v13 = vmul.f32 %v602_v10, %v577_v7 }
 0x23d   : > { %v806_v14 = vpop.eup %805  ;;  %v605_v15 = vmul.f32 %v597_v12, %v572_v11 }
 0x23e   : > { %v808_v16 = vpop.eup %807  ;;  %618 = vst.msk [vmem:[%s987_s26 + $0x28] sm:$0xff] %vm251_vm0, %v610_v13  ;;  %v600_v18 = vadd.f32 1.0, %v806_v14 }
 0x23f   : > { %613 = vst.msk [vmem:[%s987_s26] sm:$0xff] %vm251_vm0, %v605_v15  ;;  %v601_v20 = vadd.f32 1.0, %v808_v16 }
 0x240   : > { %v608_v21 = vmul.f32 %v600_v18, %v575_v17 }
 0x241   : > { %v810_v22 = vpop.eup %809  ;;  %v609_v23 = vmul.f32 %v601_v20, %v576_v19 }
 0x242   : > { %v812_v24 = vpop.eup %811  ;;  %616 = vst.msk [vmem:[%s987_s26 + $0x18] sm:$0xff] %vm251_vm0, %v608_v21  ;;  %v604_v26 = vadd.f32 1.0, %v810_v22 }
 0x243   : > { %617 = vst.msk [vmem:[%s987_s26 + $0x20] sm:$0xff] %vm251_vm0, %v609_v23  ;;  %v599_v28 = vadd.f32 1.0, %v812_v24 }
 0x244   : > { %v612_v29 = vmul.f32 %v604_v26, %v579_v25 }
 0x245   : > { %v814_v30 = vpop.eup %813  ;;  %v607_v31 = vmul.f32 %v599_v28, %v574_v27 }
 0x246   : > { %620 = vst.msk [vmem:[%s987_s26 + $0x38] sm:$0xff] %vm251_vm0, %v612_v29  ;;  %v603_v46 = vadd.f32 1.0, %v814_v30 }
 0x247   : > { %615 = vst.msk [vmem:[%s987_s26 + $0x10] sm:$0xff] %vm251_vm0, %v607_v31 }
 0x248   : > { %v611_v33 = vmul.f32 %v603_v46, %v578_v32 }
 0x24a   : > { %619 = vst.msk [vmem:[%s987_s26 + $0x30] sm:$0xff] %vm251_vm0, %v611_v33 }
 0x24b PF: > { %s15_s18 = sadd.s32 1, %s821_s18  }
 0x24c   : > { %p12_p4 = scmp.ge.s32.totalorder %s15_s18, 4  }
 0x24e   :  { %14 = sbr.rel (!%p12_p4) target bundleno = 1 (0x1), region = 70 }

</bundles_post_ra>
